<compile_context>
chip_gen: v5e
topology: v5e:2x2
jax: 0.10.0
libtpu: 0.0.40
codegen_flags: <defaults>
</compile_context>

<pallas_src>
import functools

import jax
import jax.numpy as jnp
from jax import lax
from jax.experimental import pallas as pl
from jax.experimental.pallas import tpu as pltpu


def _focal_tile_kernel(logits_ref, targets_ref, out_ref, *,
                       n_rows: int, tile_n: int, upcast: bool):
    # logits_ref : [TILE_N, C] (caller dtype) VMEM
    # targets_ref: [TILE_N, 1] int32 VMEM
    # out_ref    : [1, 8, 128] f32 VMEM — this tile's partial CE sum, broadcast.
    i = pl.program_id(0)
    num_tiles = pl.num_programs(0)

    x = logits_ref[...]
    if upcast:
        x = x.astype(jnp.float32)          # f32 elementwise path (v5e / non-bf16)
    tn, c = x.shape
    tgt = targets_ref[...]                 # [TILE_N, 1] int32

    # Numerically stable log-softmax pieces, fused: gather the target logit from
    # the already-shifted tile so row_max never needs to be re-added.  Elementwise
    # ops stay in the input dtype (bf16 on v6e/v7x); row reductions accumulate f32.
    row_max = jnp.max(x, axis=-1, keepdims=True)                       # [TILE_N, 1]
    shifted = x - row_max                                              # [TILE_N, C]
    sumexp = jnp.sum(jnp.exp(shifted), axis=-1, keepdims=True,
                     dtype=jnp.float32)                                # [TILE_N, 1] f32
    col_ids = lax.broadcasted_iota(jnp.int32, (tn, c), 1)              # [TILE_N, C]
    picked = jnp.sum(jnp.where(col_ids == tgt, shifted, jnp.zeros_like(shifted)),
                     axis=-1, keepdims=True, dtype=jnp.float32)        # [TILE_N, 1] f32
    ce_row = jnp.log(sumexp) - picked                                  # [TILE_N, 1] f32

    # Per-tile partial sum, broadcast across the lane-dense output block.
    out_ref[...] = jnp.full(out_ref.shape, jnp.sum(ce_row), jnp.float32)

    if n_rows % tile_n != 0:
        # Only the last tile is ragged: mask its padded rows there (and only there).
        @pl.when(i == num_tiles - 1)
        def _mask_partial_tile():
            rows = i * tile_n + lax.broadcasted_iota(jnp.int32, (tn, 1), 0)
            masked = jnp.where(rows < n_rows, ce_row, jnp.zeros_like(ce_row))
            out_ref[...] = jnp.full(out_ref.shape, jnp.sum(masked), jnp.float32)


def _elementwise_upcast(dtype) -> bool:
    """True -> upcast the tile to f32 inside the kernel before elementwise math."""
    if dtype == jnp.float32:
        return False
    if dtype == jnp.bfloat16:
        # Keep bf16 elementwise only on chips with a bf16 VPU/EUP (v6e / v7x).
        try:
            kind = jax.devices()[0].device_kind.lower()
        except Exception:
            return True
        return not ("v6" in kind or "v7" in kind)
    return True


def _choose_tile_n(n: int, c: int, itemsize: int) -> int:
    # ~4 MiB logits tile (double-buffered) amortizes the ~0.35 us per-grid-step
    # overhead on v6e/v7x while staying well inside the 48 MiB VMEM limit below.
    budget = 4 * 1024 * 1024
    t = budget // max(1, c * itemsize)
    t = max(8, min(2048, (t // 8) * 8))
    if n <= t:
        return n            # single full-extent tile (no 8-divisibility needed)
    return t


def focal_loss(inputs, targets, gamma=2.0, alpha=None, reduction="mean", tile_n=None):
    """inputs: [N, C] float logits (any float dtype), targets: [N] int class indices."""
    n, c = inputs.shape
    targets_2d = targets.astype(jnp.int32).reshape(n, 1)

    if tile_n is None:
        tile_n = _choose_tile_n(n, c, inputs.dtype.itemsize)
    tile_n = int(tile_n)
    if tile_n >= n:
        tile_n = n
    else:
        tile_n = max(8, (tile_n // 8) * 8)   # (8, 128) block rule on the sublane dim
    num_tiles = int(pl.cdiv(n, tile_n))
    upcast = _elementwise_upcast(inputs.dtype)

    grid_spec = pltpu.PrefetchScalarGridSpec(
        num_scalar_prefetch=0,
        grid=(num_tiles,),
        in_specs=[
            pl.BlockSpec((tile_n, c), lambda i: (i, 0)),
            pl.BlockSpec((tile_n, 1), lambda i: (i, 0)),
        ],
        # One independent, lane-dense (8,128) f32 block per tile -> "parallel" grid.
        out_specs=pl.BlockSpec((1, 8, 128), lambda i: (i, 0, 0)),
    )

    partial_blocks = pl.pallas_call(
        functools.partial(_focal_tile_kernel,
                          n_rows=n, tile_n=tile_n, upcast=upcast),
        out_shape=jax.ShapeDtypeStruct((num_tiles, 8, 128), jnp.float32),
        grid_spec=grid_spec,
        compiler_params=pltpu.CompilerParams(
            dimension_semantics=("parallel",),          # independent tiles -> megacore
            vmem_limit_bytes=48 * 1024 * 1024),
        cost_estimate=pl.CostEstimate(
            flops=6 * n * c,
            transcendentals=n * c,
            bytes_accessed=n * c * inputs.dtype.itemsize + n * 4
                           + num_tiles * 8 * 128 * 4),
    )(inputs, targets_2d)

    # Tiny scalar epilogue in the wrapper: mean CE + focal transform (f32).
    ce = jnp.sum(partial_blocks[:, 0, 0]) / jnp.float32(n)
    pt = jnp.exp(-ce)
    base = jnp.maximum(1.0 - pt, 0.0)       # clamp: avoid NaN from pow near ce==0
    g = float(gamma)
    if g == int(g):
        focal_scalar = lax.integer_pow(base, int(g)) * ce
    else:
        focal_scalar = base ** jnp.float32(g) * ce

    # Matches the PyTorch module: alpha multiplies the already mean-reduced scalar.
    if alpha is not None:
        alpha_t = jnp.take(jnp.asarray(alpha), targets)   # [N]
        focal_vec = alpha_t * focal_scalar                 # [N]
        if reduction == "mean":
            return jnp.mean(focal_vec)
        elif reduction == "sum":
            return jnp.sum(focal_vec)
        else:
            return focal_vec
    return focal_scalar


def _reference(inputs, targets, gamma=2.0):
    logp = jax.nn.log_softmax(inputs.astype(jnp.float32), axis=-1)
    nll = -jnp.take_along_axis(logp, targets[:, None], axis=-1)[:, 0]
    ce = jnp.mean(nll)
    pt = jnp.exp(-ce)
    return (1.0 - pt) ** gamma * ce


if __name__ == "__main__":
    key = jax.random.PRNGKey(0)
    k1, k2 = jax.random.split(key)
    N, C = 20, 32
    inputs = jax.random.normal(k1, (N, C), dtype=jnp.float32)
    targets = jax.random.randint(k2, (N,), 0, C, dtype=jnp.int32)

    # Multi-tile path (3 grid steps, partial last tile -> exercises the ragged mask
    # and the per-tile partial-sum reduction).
    out = focal_loss(inputs, targets, gamma=2.0, alpha=None, reduction="mean", tile_n=8)
    out = jax.block_until_ready(out)
    ref = _reference(inputs, targets, gamma=2.0)
    assert jnp.allclose(out, ref, rtol=1e-5, atol=1e-5), (out, ref)

    # alpha path (scalar epilogue).
    alpha = jnp.linspace(0.5, 1.5, C, dtype=jnp.float32)
    out_a = focal_loss(inputs, targets, gamma=2.0, alpha=alpha, reduction="mean", tile_n=8)
    out_a = jax.block_until_ready(out_a)
    ref_a = jnp.mean(alpha[targets] * ref)
    assert jnp.allclose(out_a, ref_a, rtol=1e-5, atol=1e-5), (out_a, ref_a)

    # Auto-tiled path with bf16 inputs read straight from HBM (bf16 elementwise on
    # v6e/v7x, f32 upcast elsewhere).
    inputs_bf16 = inputs.astype(jnp.bfloat16)
    out_bf16 = focal_loss(inputs_bf16, targets, gamma=2.0)
    out_bf16 = jax.block_until_ready(out_bf16)
    ref_bf16 = _reference(inputs_bf16.astype(jnp.float32), targets, gamma=2.0)
    assert jnp.allclose(out_bf16, ref_bf16, rtol=2e-2, atol=2e-2), (out_bf16, ref_bf16)

    print("KERNEL_OK")
</pallas_src>

<mosaic_0001>
module attributes {stable_mosaic.version = 11 : i64} {
  func.func @_focal_tile_kernel(%arg0: i32, %arg1: memref<8x32xf32, #tpu.memory_space<vmem>>, %arg2: memref<8x1xi32, #tpu.memory_space<vmem>>, %arg3: memref<1x8x128xf32, #tpu.memory_space<vmem>>) attributes {dimension_semantics = [#tpu.dimension_semantics<parallel>], iteration_bounds = array<i64: 3>, scalar_prefetch = 0 : i64, scratch_operands = 0 : i64, tpu.core_type = #tpu.core_type<tc>, window_params = [{transform_indices = @transform_0, window_bounds = array<i64: 8, 32>}, {transform_indices = @transform_1, window_bounds = array<i64: 8, 1>}, {transform_indices = @transform_2, window_bounds = array<i64: 1, 8, 128>}]} {
    %c0 = arith.constant 0 : index
    %c0_0 = arith.constant 0 : index
    %0 = vector.load %arg1[%c0, %c0_0] : memref<8x32xf32, #tpu.memory_space<vmem>>, vector<8x32xf32>
    %c0_1 = arith.constant 0 : index
    %c0_2 = arith.constant 0 : index
    %1 = vector.load %arg2[%c0_1, %c0_2] : memref<8x1xi32, #tpu.memory_space<vmem>>, vector<8x1xi32>
    %cst = arith.constant dense<0xFF800000> : vector<8xf32>
    %2 = vector.multi_reduction <maximumf>, %0, %cst [1] : vector<8x32xf32> to vector<8xf32>
    %3 = vector.shape_cast %2 : vector<8xf32> to vector<8x1xf32>
    %4 = vector.broadcast %3 : vector<8x1xf32> to vector<8x32xf32>
    %5 = arith.subf %0, %4 : vector<8x32xf32>
    %6 = math.exp %5 : vector<8x32xf32>
    %cst_3 = arith.constant dense<0.000000e+00> : vector<8xf32>
    %7 = vector.multi_reduction <add>, %6, %cst_3 [1] : vector<8x32xf32> to vector<8xf32>
    %8 = vector.shape_cast %7 : vector<8xf32> to vector<8x1xf32>
    %9 = tpu.iota {dimensions = array<i32: 1>} : vector<8x32xi32>
    %10 = vector.broadcast %1 : vector<8x1xi32> to vector<8x32xi32>
    %11 = arith.cmpi eq, %9, %10 : vector<8x32xi32>
    %cst_4 = arith.constant 0.000000e+00 : f32
    %12 = vector.broadcast %cst_4 : f32 to vector<8x32xf32>
    %13 = arith.select %11, %5, %12 : vector<8x32xi1>, vector<8x32xf32>
    %cst_5 = arith.constant dense<0.000000e+00> : vector<8xf32>
    %14 = vector.multi_reduction <add>, %13, %cst_5 [1] : vector<8x32xf32> to vector<8xf32>
    %15 = vector.shape_cast %14 : vector<8xf32> to vector<8x1xf32>
    %16 = math.log %8 : vector<8x1xf32>
    %17 = arith.subf %16, %15 : vector<8x1xf32>
    %18 = vector.shape_cast %17 : vector<8x1xf32> to vector<1x8x1xf32>
    %cst_6 = arith.constant dense<0.000000e+00> : vector<1xf32>
    %19 = vector.multi_reduction <add>, %18, %cst_6 [1, 2] : vector<1x8x1xf32> to vector<1xf32>
    %20 = vector.shape_cast %19 : vector<1xf32> to vector<1x1x1xf32>
    %21 = vector.extract %20[0, 0, 0] : f32 from vector<1x1x1xf32>
    %22 = vector.broadcast %21 : f32 to vector<1x8x128xf32>
    %c0_7 = arith.constant 0 : index
    %c0_8 = arith.constant 0 : index
    %c0_9 = arith.constant 0 : index
    %23 = vector.load %arg3[%c0_7, %c0_8, %c0_9] : memref<1x8x128xf32, #tpu.memory_space<vmem>>, vector<1x8x128xf32>
    tpu.vector_store %arg3[%c0_7, %c0_8, %c0_9], %22 {strides = array<i32>} : memref<1x8x128xf32, #tpu.memory_space<vmem>>, vector<1x8x128xf32>,
    %c2_i32 = arith.constant 2 : i32
    %24 = arith.cmpi eq, %arg0, %c2_i32 : i32
    %25 = arith.extui %24 : i1 to i32
    %c0_i32 = arith.constant 0 : i32
    %26 = arith.cmpi ne, %25, %c0_i32 : i32
    scf.if %26 {
      %c8_i32 = arith.constant 8 : i32
      %27 = arith.muli %arg0, %c8_i32 : i32
      %28 = tpu.iota {dimensions = array<i32: 0>} : vector<8x1xi32>
      %29 = vector.broadcast %27 : i32 to vector<8x1xi32>
      %30 = arith.addi %29, %28 : vector<8x1xi32>
      %c20_i32 = arith.constant 20 : i32
      %31 = vector.broadcast %c20_i32 : i32 to vector<8x1xi32>
      %32 = arith.cmpi slt, %30, %31 : vector<8x1xi32>
      %cst_10 = arith.constant 0.000000e+00 : f32
      %33 = vector.broadcast %cst_10 : f32 to vector<8x1xf32>
      %34 = arith.select %32, %17, %33 : vector<8x1xi1>, vector<8x1xf32>
      %35 = vector.shape_cast %34 : vector<8x1xf32> to vector<1x8x1xf32>
      %cst_11 = arith.constant dense<0.000000e+00> : vector<1xf32>
      %36 = vector.multi_reduction <add>, %35, %cst_11 [1, 2] : vector<1x8x1xf32> to vector<1xf32>
      %37 = vector.shape_cast %36 : vector<1xf32> to vector<1x1x1xf32>
      %38 = vector.extract %37[0, 0, 0] : f32 from vector<1x1x1xf32>
      %39 = vector.broadcast %38 : f32 to vector<1x8x128xf32>
      %c0_12 = arith.constant 0 : index
      %c0_13 = arith.constant 0 : index
      %c0_14 = arith.constant 0 : index
      %40 = vector.load %arg3[%c0_12, %c0_13, %c0_14] : memref<1x8x128xf32, #tpu.memory_space<vmem>>, vector<1x8x128xf32>
      tpu.vector_store %arg3[%c0_12, %c0_13, %c0_14], %39 {strides = array<i32>} : memref<1x8x128xf32, #tpu.memory_space<vmem>>, vector<1x8x128xf32>,
    } else {
    }
    return
  }
  func.func @transform_0(%arg0: i32) -> (i32, i32) {
    %c0_i32 = arith.constant 0 : i32
    %c0_i32_0 = arith.constant 0 : i32
    return %arg0, %c0_i32 : i32, i32
  }
  func.func @transform_1(%arg0: i32) -> (i32, i32) {
    %c0_i32 = arith.constant 0 : i32
    %c0_i32_0 = arith.constant 0 : i32
    return %arg0, %c0_i32 : i32, i32
  }
  func.func @transform_2(%arg0: i32) -> (i32, i32, i32) {
    %c0_i32 = arith.constant 0 : i32
    %c0_i32_0 = arith.constant 0 : i32
    %c0_i32_1 = arith.constant 0 : i32
    return %arg0, %c0_i32, %c0_i32_0 : i32, i32, i32
  }
}

</mosaic_0001>

<bundles_post_ra>
// kernel: tpu_custom_call.1
= control target key start
LH: loop header
LB: loop body
LE: loop exit
PB: predicated region body
PF: predicated region fallthrough
CT: control target
= control target key end

     0   :  { %7 = vsyncpa [#allocation3], 0  ;;  %s545_s0 = inlined_call_operand.vmem [shape: f32[20,32], index: 0, kind: input, shape index: {}]   ;;  %s546_s1 = inlined_call_operand.vmem [shape: s32[20,1], index: 1, kind: input, shape index: {}]   ;;  %s547_s2 = inlined_call_operand.hbm [shape: f32[3,8,128], index: 2, kind: output, shape index: {}]  }
   0x1   :  { %9 = vsyncpa [#allocation3 + $0x1], 0  ;;  %s446_s9 = smov 0   ;;  %s448_s10 = smov 0  }
   0x2   :  { %s450_s11 = smov 0   ;;  %s452_s12 = smov 0  }
   0x3 LB: > { %s467_s13 = sadd.s32 4294967295, %s428_s12   ;;  %s304_s14 = sadd.s32 4294967294, %s428_s12   ;;  %s428_s12 = sphi %s452_s12, %s553_s12   ;;  %s424_s11 = sphi %s450_s11, %s552_s11   ;;  %s420_s10 = sphi %s448_s10, %s551_s10   ;;  %s416_s9 = sphi %s446_s9, %s550_s9  }
   0x4   : > { %s471_s15 = sadd.s32 1, %s428_s12   ;;  %s74_s16 = sadd.s32 1, %s424_s11 }
   0x5   : > { %s71_s17 = ssub.s32 %s428_s12, %s471_s15  ;;  %p84_p0 = scmp.ne.s32.totalorder %s424_s11, %s420_s10 }
   0x6   : > { %p72_p1 = scmp.eq.s32.totalorder %s71_s17, 0  ;;  %p85_p2 = scmp.eq.s32.totalorder %s467_s13, 2 }
   0x7   : > { %p90_p3 = scmp.ne.s32.totalorder %s420_s10, %s416_s9  ;;  %p91_p4 = scmp.eq.s32.totalorder %s304_s14, 2 }
   0x8   : > { %s482_s18 = scalar_select %p72_p1, %s424_s11, %s74_s16  }
   0x9   : > { %p484_p5 = por %p85_p2, %p84_p0  ;;  %p488_p6 = por %p91_p4, %p90_p3 }
   0xa   : > { %p307_p7 = scmp.ge.s32.totalorder %s428_s12, 1  ;;  %p123_p8 = scmp.lt.s32.totalorder %s428_s12, 4 }
   0xc   : > { %p124_p9 = pnand %p307_p7, %p123_p8 }
   0xd   : > { %p148_p10 = scmp.lt.s32.totalorder (!%p124_p9), %s467_s13, 2  ;;  %s145_s29 = sand.u32 (!%p124_p9), 1, %s420_s10  }
   0xe   : > { %127 = sbr.rel (%p124_p9) target bundleno = 664 (0x298), region = 28  ;;  %s308_s30 = sshll.u32 (!%p124_p9), %s145_s29, 3 }
   0xf   : > { %s147_s4 = scalar_lea.vmem (!%p124_p9), [#allocation2], %s308_s30  ;;  %p311_p11 = scmp.ne.s32.totalorder (!%p124_p9), %s467_s13, 2 }
  0x13   : > { %v430_v0 = vmov 0   ;;  %s149_s21 = scalar_select %p148_p10, %s467_s13, 2  ;;  %vm158_vm0 = vcmask 261120   ;;  %v168_v9 = vlaneseq  ;;  %vm181_vm2 = vcmask 7168  }
  0x14   : > { %361 = vset.pattern.permute.xlu0 %v430_v0  ;;  %s312_s5 = sshll.u32 (!%p311_p11), %s467_s13, 3 }
  0x15   : > { %s309_s22 = sshll.u32 %s149_s21, 3  ;;  %v169_v10 = vand.u32 127, %v168_v9 }
  0x16   : > { %s151_s25 = scalar_lea.vmem %s545_s0, %s309_s22  ;;  %s155_s28 = scalar_lea.vmem %s546_s1, %s309_s22 }
  0x17   : > { %v156_v1 = vld [vmem:[%s151_s25] sm:$0xff] }
  0x18   : > { %v159_v2 = vsel %vm158_vm0, %v156_v1, -inf  ;;  %v157_v3 = vld [vmem:[%s155_s28] sm:$0xff] }
  0x19   : > { %160 = vmax.xlane.f32.xlu0 %v159_v2 }
  0x2d   : > { %171 = vperm.xlu0 %361, %v157_v3  }
  0x8c   : > { %v161_v4 = vpop.xlane.xlu0 %160 }
  0x8d   : > { %v162_v5 = vsub.f32 %v156_v1, %v161_v4 }
  0x8f   : > { %v163_v6 = vmul.f32 1.442695, %v162_v5 }
  0x91   : > { %362 = vpow2.f32 %v163_v6 }
  0x97   : > { %v363_v7 = vpop.eup %362 }
  0x98   : > { %v165_v8 = vsel %vm158_vm0, %v363_v7, 0.0 }
  0x99   : > { %166 = vadd.xlane.f32.xlu1 %v165_v8 }
  0x9f   : > { %v172_v11 = vpop.permute.xlu0 %171 }
  0xa0   : > { %vm173_vm1 = vcmp.eq.s32.totalorder %v169_v10, %v172_v11 }
  0xa1   : > { %v174_v12 = vsel %vm173_vm1, %v162_v5, 0.0 }
  0xa2   : > { %v175_v13 = vsel %vm158_vm0, %v174_v12, 0.0 }
  0xa3   : > { %176 = vadd.xlane.f32.xlu1 %v175_v13 }
 0x10c   : > { %v167_v14 = vpop.xlane.xlu1 %166 }
 0x10d   : > { %364 = vlog2.f32 %v167_v14 }
 0x113   : > { %v365_v15 = vpop.eup %364 }
 0x114   : > { %v179_v16 = vmul.f32 0.6931472, %v365_v15 }
 0x116   : > { %v177_v17 = vpop.xlane.xlu1 %176 }
 0x117   : > { %v180_v18 = vsub.f32 %v179_v16, %v177_v17 }
 0x119   : > { %v182_v19 = vsel %vm181_vm2, %v180_v18, 0.0 }
 0x11a   : > { %183 = vadd.xlane.f32.xlu2 %v182_v19 }
 0x18d   : > { %v184_v20 = vpop.xlane.xlu2 %183 }
 0x18e   : > { %v185_v21 = vrot.slane %v184_v20, 4 }
 0x190   : > { %v186_v22 = vadd.f32 %v185_v21, %v184_v20 }
 0x192   : > { %v187_v23 = vrot.slane %v186_v22, 2 }
 0x194   : > { %v188_v24 = vadd.f32 %v187_v23, %v186_v22 }
 0x196   : > { %v189_v25 = vrot.slane %v188_v24, 1 }
 0x198   : > { %v190_v26 = vadd.f32 %v189_v25, %v188_v24 }
 0x19a   : > { %317 = vpush %v190_v26 }
 0x1c9   : > { %197 = sbr.rel (%p311_p11) target bundleno = 649 (0x289), region = 32 }
 0x1cb   : > { %s318_s3 = spop %317 }
 0x1cc   : > { %v192_v27 = vstv %s318_s3 }
 0x1cd   : > { %193 = vst [vmem:[%s147_s4] sm:$0xff] %v192_v27 }
 0x1ce   : > { %v200_v28 = vshrl.u32 %v168_v9, 7  ;;  %v201_v29 = vstv %s312_s5 }
 0x1d0   : > { %v202_v30 = vadd.s32 %v201_v29, %v200_v28 }
 0x1d2   : > { %vm203_vm3 = vcmp.lt.s32.totalorder %v202_v30, 20 }
 0x1d3   : > { %v204_v31 = vsel %vm203_vm3, %v180_v18, 0.0 }
 0x1d4   : > { %v205_v32 = vsel %vm181_vm2, %v204_v31, 0.0 }
 0x1d5   : > { %206 = vadd.xlane.f32.xlu0 %v205_v32 }
 0x248   : > { %v207_v33 = vpop.xlane.xlu0 %206 }
 0x249   : > { %v208_v34 = vrot.slane %v207_v33, 4 }
 0x24b   : > { %v209_v35 = vadd.f32 %v208_v34, %v207_v33 }
 0x24d   : > { %v210_v36 = vrot.slane %v209_v35, 2 }
 0x24f   : > { %v211_v37 = vadd.f32 %v210_v36, %v209_v35 }
 0x251   : > { %v212_v38 = vrot.slane %v211_v37, 1 }
 0x253   : > { %v213_v39 = vadd.f32 %v212_v38, %v211_v37 }
 0x255   : > { %319 = vpush %v213_v39 }
 0x286   : > { %s320_s6 = spop %319 }
 0x287   : > { %v215_v40 = vstv %s320_s6 }
 0x288   : > { %216 = vst [vmem:[%s147_s4] sm:$0xff] %v215_v40 }
 0x289 PF: > { %s314_s7 = sshll.u32 %s467_s13, 3  ;;  %s230_s17 = sshll.u32 %s147_s4, 4  ;;  %s231_s17 = int_to_ptr.vmem [resolvable:$true] %s230_s17 }
 0x28a   : > { %s228_s16 = scalar_lea.hbm %s547_s2, %s314_s7  ;;  %s218_s22 = scalar_lea.sflag [#allocation3], %s145_s29 }
 0x28b   : > { %s232_s21 = sshll.u32 %s228_s16, 4  ;;  %s386_s13 = scalar_lea.hbm %s547_s2, 24  ;;  %s233_s21 = int_to_ptr.hbm [resolvable:$true] %s232_s21 }
 0x28c   : > { %s380_s23 = sshra.s32 %s233_s21, 4  ;;  %s381_s23 = int_to_ptr.hbm [resolvable:$true] %s380_s23 }
 0x28d   : > { %s382_s24 = scalar_lea.hbm %s381_s23, 8  ;;  %p387_p1 = scmp.lt.s32.totalorder %s381_s23, %s547_s2 }
 0x28e   : > { %p383_p12 = scmp.ne.s32.totalorder %s381_s23, %s382_s24  ;;  %p388_p2 = scmp.lt.s32.totalorder %s386_s13, %s382_s24 }
 0x290   : > { %p384_p13 = pnand %p383_p12, %p484_p5  ;;  %p389_p3 = por %p388_p2, %p387_p1 }
 0x292   : > { %p385_p0 = pneg %p384_p13 }
 0x294   : > { %p390_p4 = pnand %p389_p3, %p385_p0 }
 0x296   : > { %393 = shalt.err (!%p390_p4)
}
 0x297   : > { %321 = dma.vmem_to_hbm [thread:$0]  (%p484_p5), %s231_s17, 128, %s233_s21, %s218_s22  }
 0x298 PF: > { %p327_p7 = scmp.ge.s32.totalorder %s428_s12, 2  ;;  %s244_s29 = sand.u32 1, %s416_s9  }
 0x299   : > { %s245_s30 = scalar_lea.sflag [#allocation3], %s244_s29 }
 0x29a   : > { %p324_p8 = pnand %p327_p7, %p488_p6 }
 0x29c   : > { %p325_p9 = pneg %p324_p8 }
 0x29e   : > { %411 = dma.done.wait (%p325_p9), %s245_s30, 128  }
 0x29f   : > { %413 = vsyncadd (%p325_p9), %s245_s30, 4294967168  ;;  %p12_p10 = scmp.ge.s32.totalorder %s471_s15, 5   ;;  %s550_s9 = smov %s420_s10 }
 0x2a0   : > { %s551_s10 = smov %s424_s11  ;;  %s552_s11 = smov %s482_s18 }
 0x2a1   : > { %s553_s12 = smov %s471_s15  ;;  %14 = sbr.rel (!%p12_p10) target bundleno = 3 (0x3), region = 70 }
 0x2a6   :  { %251 = vsyncpa [#allocation3], 1 }
 0x2a7   :  { %253 = vsyncpa [#allocation3 + $0x1], 1 }

</bundles_post_ra>
